<compile_context>
chip_gen: v7x
topology: tpu7x:2x2x1
jax: 0.10.0
libtpu: 0.0.40
codegen_flags: <defaults>
</compile_context>

<pallas_src>
import jax
import jax.numpy as jnp
from jax.experimental import pallas as pl
from jax.experimental.pallas import tpu as pltpu


def _round_up(x: int, m: int) -> int:
    return ((x + m - 1) // m) * m


def _mlp_kernel(*refs):
    """Fused MLP on one batch tile.

    refs = [x_ref, w0_ref, b0_ref, w1_ref, b1_ref, ..., o_ref]
    """
    x_ref, o_ref = refs[0], refs[-1]
    params = refs[1:-1]
    n_lin = len(params) // 2

    h = x_ref[...]  # (BM, D0_pad) f32
    for i in range(n_lin):  # static Python loop -> fully unrolled at trace time
        w = params[2 * i][...]       # (Din_pad, Dout_pad)
        b = params[2 * i + 1][...]   # (1, Dout_pad), broadcasts over rows
        h = jnp.dot(h, w, preferred_element_type=jnp.float32) + b
        if i < n_lin - 1:            # ReLU after every layer except the last
            h = jnp.maximum(h, 0.0)
    o_ref[...] = h.astype(o_ref.dtype)


def alternative_surrogate_forward(x, weights, biases):
    """Pallas implementation of AlternativeSurrogateNetwork.forward.

    x:       (B, n_input) float32
    weights: list of (in_i, out_i) float32 matrices (math layout: y = x @ W + b)
    biases:  list of (out_i,)  float32 vectors
    Returns: (B, 1) float32
    """
    B, n_input = x.shape
    n_lin = len(weights)
    out_dim = weights[-1].shape[1]  # == 1 for this network

    LANE, SUB = 128, 8

    # Padded feature dims (all multiples of 128 -> lane-dense, full MXU tiles).
    dims = [n_input] + [w.shape[1] for w in weights]
    dims_p = [_round_up(d, LANE) for d in dims]

    # Batch tiling: blocks of up to 128 rows, multiple of 8 sublanes.
    B_pad0 = _round_up(B, SUB)
    BM = min(128, B_pad0)
    B_pad = _round_up(B, BM)
    grid_m = B_pad // BM

    # Zero-pad input and parameters.
    xp = jnp.zeros((B_pad, dims_p[0]), jnp.float32).at[:B, :n_input].set(x)
    params_padded = []
    for i, (w, b) in enumerate(zip(weights, biases)):
        din, dout = w.shape
        wp = jnp.zeros((dims_p[i], dims_p[i + 1]), jnp.float32).at[:din, :dout].set(w)
        bp = jnp.zeros((1, dims_p[i + 1]), jnp.float32).at[0, :dout].set(b)
        params_padded += [wp, bp]

    # BlockSpecs:
    #  - x / out: tiled over the batch grid axis (lane-dense last dim).
    #  - weights / biases: single full-array block with a constant index_map,
    #    i.e. resident in VMEM for the entire grid (no re-DMA per batch tile).
    in_specs = [pl.BlockSpec((BM, dims_p[0]), lambda i: (i, 0))]
    for li in range(n_lin):
        din_p, dout_p = dims_p[li], dims_p[li + 1]
        in_specs.append(pl.BlockSpec((din_p, dout_p), lambda i: (0, 0)))
        in_specs.append(pl.BlockSpec((1, dout_p), lambda i: (0, 0)))
    out_spec = pl.BlockSpec((BM, dims_p[-1]), lambda i: (i, 0))

    out_padded = pl.pallas_call(
        _mlp_kernel,
        out_shape=jax.ShapeDtypeStruct((B_pad, dims_p[-1]), jnp.float32),
        grid_spec=pltpu.PrefetchScalarGridSpec(
            num_scalar_prefetch=0,
            grid=(grid_m,),
            in_specs=in_specs,
            out_specs=out_spec,
        ),
        compiler_params=pltpu.CompilerParams(
            # Batch tiles are independent -> shard across TCs (v7x megacore).
            dimension_semantics=("parallel",),
        ),
    )(xp, *params_padded)

    # Strip batch / output-lane padding.
    return out_padded[:B, :out_dim]


def _reference_forward(x, weights, biases):
    """Pure-JAX reference matching the PyTorch nn.Sequential forward."""
    h = x
    for i, (w, b) in enumerate(zip(weights, biases)):
        h = h @ w + b
        if i < len(weights) - 1:
            h = jnp.maximum(h, 0.0)
    return h


if __name__ == "__main__":
    # Small shapes consistent with the module: n_input=4, hidden=32, 2 hidden
    # layers, batch=16.
    n_input, hidden_size, num_hidden_layers, batch = 4, 32, 2, 16

    key = jax.random.PRNGKey(0)
    keys = jax.random.split(key, 2 * (num_hidden_layers + 2) + 1)

    # Layer sizes: n_input -> H -> H*L -> 1
    sizes = [n_input, hidden_size] + [hidden_size] * num_hidden_layers + [1]
    weights, biases = [], []
    for li in range(len(sizes) - 1):
        din, dout = sizes[li], sizes[li + 1]
        w = jax.random.normal(keys[2 * li], (din, dout), jnp.float32) * 0.2
        b = jax.random.normal(keys[2 * li + 1], (dout,), jnp.float32) * 0.1
        weights.append(w)
        biases.append(b)

    x = jax.random.normal(keys[-1], (batch, n_input), dtype=jnp.float32)

    y = alternative_surrogate_forward(x, weights, biases)
    y = jax.block_until_ready(y)

    y_ref = _reference_forward(x, weights, biases)

    assert y.shape == (batch, 1), y.shape
    assert jnp.allclose(y, y_ref, atol=1e-5, rtol=1e-5), (
        float(jnp.max(jnp.abs(y - y_ref)))
    )

    print("KERNEL_OK")
</pallas_src>

<mosaic_0001>
module attributes {stable_mosaic.version = 11 : i64} {
  func.func @_mlp_kernel(%arg0: i32, %arg1: memref<16x128xf32, #tpu.memory_space<vmem>>, %arg2: memref<128x128xf32, #tpu.memory_space<vmem>>, %arg3: memref<1x128xf32, #tpu.memory_space<vmem>>, %arg4: memref<128x128xf32, #tpu.memory_space<vmem>>, %arg5: memref<1x128xf32, #tpu.memory_space<vmem>>, %arg6: memref<128x128xf32, #tpu.memory_space<vmem>>, %arg7: memref<1x128xf32, #tpu.memory_space<vmem>>, %arg8: memref<128x128xf32, #tpu.memory_space<vmem>>, %arg9: memref<1x128xf32, #tpu.memory_space<vmem>>, %arg10: memref<16x128xf32, #tpu.memory_space<vmem>>) attributes {dimension_semantics = [#tpu.dimension_semantics<parallel>], iteration_bounds = array<i64: 1>, scalar_prefetch = 0 : i64, scratch_operands = 0 : i64, tpu.core_type = #tpu.core_type<tc>, window_params = [{transform_indices = @transform_0, window_bounds = array<i64: 16, 128>}, {pipeline_mode = #tpu.pipeline_mode<synchronous>, transform_indices = @transform_1, window_bounds = array<i64: 128, 128>}, {pipeline_mode = #tpu.pipeline_mode<synchronous>, transform_indices = @transform_2, window_bounds = array<i64: 1, 128>}, {pipeline_mode = #tpu.pipeline_mode<synchronous>, transform_indices = @transform_3, window_bounds = array<i64: 128, 128>}, {pipeline_mode = #tpu.pipeline_mode<synchronous>, transform_indices = @transform_4, window_bounds = array<i64: 1, 128>}, {pipeline_mode = #tpu.pipeline_mode<synchronous>, transform_indices = @transform_5, window_bounds = array<i64: 128, 128>}, {pipeline_mode = #tpu.pipeline_mode<synchronous>, transform_indices = @transform_6, window_bounds = array<i64: 1, 128>}, {pipeline_mode = #tpu.pipeline_mode<synchronous>, transform_indices = @transform_7, window_bounds = array<i64: 128, 128>}, {pipeline_mode = #tpu.pipeline_mode<synchronous>, transform_indices = @transform_8, window_bounds = array<i64: 1, 128>}, {transform_indices = @transform_9, window_bounds = array<i64: 16, 128>}]} {
    %c0 = arith.constant 0 : index
    %c0_0 = arith.constant 0 : index
    %0 = vector.load %arg1[%c0, %c0_0] : memref<16x128xf32, #tpu.memory_space<vmem>>, vector<16x128xf32>
    %c0_1 = arith.constant 0 : index
    %c0_2 = arith.constant 0 : index
    %1 = vector.load %arg2[%c0_1, %c0_2] : memref<128x128xf32, #tpu.memory_space<vmem>>, vector<128x128xf32>
    %c0_3 = arith.constant 0 : index
    %c0_4 = arith.constant 0 : index
    %2 = vector.load %arg3[%c0_3, %c0_4] : memref<1x128xf32, #tpu.memory_space<vmem>>, vector<1x128xf32>
    %cst = arith.constant dense<0.000000e+00> : vector<16x128xf32>
    %3 = tpu.matmul %0, %1, %cst {dimension_numbers = #tpu.dot_dimension_numbers<[1], [0], [0], [1], [0, 0, 1, 1], [], []>} : vector<16x128xf32>, vector<128x128xf32>, vector<16x128xf32> -> vector<16x128xf32>
    %4 = vector.broadcast %2 : vector<1x128xf32> to vector<16x128xf32>
    %5 = arith.addf %3, %4 : vector<16x128xf32>
    %cst_5 = arith.constant 0.000000e+00 : f32
    %6 = vector.broadcast %cst_5 : f32 to vector<16x128xf32>
    %7 = arith.maximumf %5, %6 : vector<16x128xf32>
    %c0_6 = arith.constant 0 : index
    %c0_7 = arith.constant 0 : index
    %8 = vector.load %arg4[%c0_6, %c0_7] : memref<128x128xf32, #tpu.memory_space<vmem>>, vector<128x128xf32>
    %c0_8 = arith.constant 0 : index
    %c0_9 = arith.constant 0 : index
    %9 = vector.load %arg5[%c0_8, %c0_9] : memref<1x128xf32, #tpu.memory_space<vmem>>, vector<1x128xf32>
    %cst_10 = arith.constant dense<0.000000e+00> : vector<16x128xf32>
    %10 = tpu.matmul %7, %8, %cst_10 {dimension_numbers = #tpu.dot_dimension_numbers<[1], [0], [0], [1], [0, 0, 1, 1], [], []>} : vector<16x128xf32>, vector<128x128xf32>, vector<16x128xf32> -> vector<16x128xf32>
    %11 = vector.broadcast %9 : vector<1x128xf32> to vector<16x128xf32>
    %12 = arith.addf %10, %11 : vector<16x128xf32>
    %cst_11 = arith.constant 0.000000e+00 : f32
    %13 = vector.broadcast %cst_11 : f32 to vector<16x128xf32>
    %14 = arith.maximumf %12, %13 : vector<16x128xf32>
    %c0_12 = arith.constant 0 : index
    %c0_13 = arith.constant 0 : index
    %15 = vector.load %arg6[%c0_12, %c0_13] : memref<128x128xf32, #tpu.memory_space<vmem>>, vector<128x128xf32>
    %c0_14 = arith.constant 0 : index
    %c0_15 = arith.constant 0 : index
    %16 = vector.load %arg7[%c0_14, %c0_15] : memref<1x128xf32, #tpu.memory_space<vmem>>, vector<1x128xf32>
    %cst_16 = arith.constant dense<0.000000e+00> : vector<16x128xf32>
    %17 = tpu.matmul %14, %15, %cst_16 {dimension_numbers = #tpu.dot_dimension_numbers<[1], [0], [0], [1], [0, 0, 1, 1], [], []>} : vector<16x128xf32>, vector<128x128xf32>, vector<16x128xf32> -> vector<16x128xf32>
    %18 = vector.broadcast %16 : vector<1x128xf32> to vector<16x128xf32>
    %19 = arith.addf %17, %18 : vector<16x128xf32>
    %cst_17 = arith.constant 0.000000e+00 : f32
    %20 = vector.broadcast %cst_17 : f32 to vector<16x128xf32>
    %21 = arith.maximumf %19, %20 : vector<16x128xf32>
    %c0_18 = arith.constant 0 : index
    %c0_19 = arith.constant 0 : index
    %22 = vector.load %arg8[%c0_18, %c0_19] : memref<128x128xf32, #tpu.memory_space<vmem>>, vector<128x128xf32>
    %c0_20 = arith.constant 0 : index
    %c0_21 = arith.constant 0 : index
    %23 = vector.load %arg9[%c0_20, %c0_21] : memref<1x128xf32, #tpu.memory_space<vmem>>, vector<1x128xf32>
    %cst_22 = arith.constant dense<0.000000e+00> : vector<16x128xf32>
    %24 = tpu.matmul %21, %22, %cst_22 {dimension_numbers = #tpu.dot_dimension_numbers<[1], [0], [0], [1], [0, 0, 1, 1], [], []>} : vector<16x128xf32>, vector<128x128xf32>, vector<16x128xf32> -> vector<16x128xf32>
    %25 = vector.broadcast %23 : vector<1x128xf32> to vector<16x128xf32>
    %26 = arith.addf %24, %25 : vector<16x128xf32>
    %c0_23 = arith.constant 0 : index
    %c0_24 = arith.constant 0 : index
    %27 = vector.load %arg10[%c0_23, %c0_24] : memref<16x128xf32, #tpu.memory_space<vmem>>, vector<16x128xf32>
    tpu.vector_store %arg10[%c0_23, %c0_24], %26 {strides = array<i32>} : memref<16x128xf32, #tpu.memory_space<vmem>>, vector<16x128xf32>,
    return
  }
  func.func @transform_0(%arg0: i32) -> (i32, i32) {
    %c0_i32 = arith.constant 0 : i32
    %c0_i32_0 = arith.constant 0 : i32
    return %arg0, %c0_i32 : i32, i32
  }
  func.func @transform_1(%arg0: i32) -> (i32, i32) {
    %c0_i32 = arith.constant 0 : i32
    %c0_i32_0 = arith.constant 0 : i32
    %c0_i32_1 = arith.constant 0 : i32
    return %c0_i32, %c0_i32_0 : i32, i32
  }
  func.func @transform_2(%arg0: i32) -> (i32, i32) {
    %c0_i32 = arith.constant 0 : i32
    %c0_i32_0 = arith.constant 0 : i32
    %c0_i32_1 = arith.constant 0 : i32
    return %c0_i32, %c0_i32_0 : i32, i32
  }
  func.func @transform_3(%arg0: i32) -> (i32, i32) {
    %c0_i32 = arith.constant 0 : i32
    %c0_i32_0 = arith.constant 0 : i32
    %c0_i32_1 = arith.constant 0 : i32
    return %c0_i32, %c0_i32_0 : i32, i32
  }
  func.func @transform_4(%arg0: i32) -> (i32, i32) {
    %c0_i32 = arith.constant 0 : i32
    %c0_i32_0 = arith.constant 0 : i32
    %c0_i32_1 = arith.constant 0 : i32
    return %c0_i32, %c0_i32_0 : i32, i32
  }
  func.func @transform_5(%arg0: i32) -> (i32, i32) {
    %c0_i32 = arith.constant 0 : i32
    %c0_i32_0 = arith.constant 0 : i32
    %c0_i32_1 = arith.constant 0 : i32
    return %c0_i32, %c0_i32_0 : i32, i32
  }
  func.func @transform_6(%arg0: i32) -> (i32, i32) {
    %c0_i32 = arith.constant 0 : i32
    %c0_i32_0 = arith.constant 0 : i32
    %c0_i32_1 = arith.constant 0 : i32
    return %c0_i32, %c0_i32_0 : i32, i32
  }
  func.func @transform_7(%arg0: i32) -> (i32, i32) {
    %c0_i32 = arith.constant 0 : i32
    %c0_i32_0 = arith.constant 0 : i32
    %c0_i32_1 = arith.constant 0 : i32
    return %c0_i32, %c0_i32_0 : i32, i32
  }
  func.func @transform_8(%arg0: i32) -> (i32, i32) {
    %c0_i32 = arith.constant 0 : i32
    %c0_i32_0 = arith.constant 0 : i32
    %c0_i32_1 = arith.constant 0 : i32
    return %c0_i32, %c0_i32_0 : i32, i32
  }
  func.func @transform_9(%arg0: i32) -> (i32, i32) {
    %c0_i32 = arith.constant 0 : i32
    %c0_i32_0 = arith.constant 0 : i32
    return %arg0, %c0_i32 : i32, i32
  }
}

</mosaic_0001>

<bundles_post_ra>
// kernel: tpu_custom_call.1
= control target key start
LH: loop header
LB: loop body
LE: loop exit
PB: predicated region body
PF: predicated region fallthrough
CT: control target
= control target key end

     0   :  { %14 = vsyncpa [#allocation3], 0  ;;  %s1188_s0 = inlined_call_operand.hbm [shape: f32[16,128], index: 0, kind: input, shape index: {}]   ;;  %s1189_s1 = inlined_call_operand.hbm [shape: f32[128,128], index: 1, kind: input, shape index: {}]   ;;  %s1190_s2 = inlined_call_operand.vmem [shape: f32[1,128], index: 2, kind: input, shape index: {}]   ;;  %s1191_s3 = inlined_call_operand.hbm [shape: f32[128,128], index: 3, kind: input, shape index: {}]   ;;  %s1192_s4 = inlined_call_operand.vmem [shape: f32[1,128], index: 4, kind: input, shape index: {}]   ;;  %s1193_s5 = inlined_call_operand.hbm [shape: f32[128,128], index: 5, kind: input, shape index: {}]   ;;  %s1194_s6 = inlined_call_operand.vmem [shape: f32[1,128], index: 6, kind: input, shape index: {}]   ;;  %s1195_s7 = inlined_call_operand.hbm [shape: f32[128,128], index: 7, kind: input, shape index: {}]   ;;  %s1196_s8 = inlined_call_operand.vmem [shape: f32[1,128], index: 8, kind: input, shape index: {}]   ;;  %s1197_s9 = inlined_call_operand.hbm [shape: f32[16,128], index: 9, kind: output, shape index: {}]  }
   0x1   :  { %15 = vsyncpa [#allocation6], 0 }
   0x2   :  { %16 = vsyncpa [#allocation9], 0 }
   0x3   :  { %17 = vsyncpa [#allocation4], 0  ;;  %s1014_s30 = smov [#allocation5]   ;;  %s1015_s11 = smov [#allocation8]  }
   0x4   :  { %s35_s10 = sshll.u32 %s1014_s30, 4  ;;  %s63_s12 = sshll.u32 %s1015_s11, 4  ;;  %s36_s10 = int_to_ptr.vmem [resolvable:$true] %s35_s10  ;;  %s1072_s12 = int_to_ptr.vmem [resolvable:$true] %s63_s12 }
   0x5   :  { %s874_s15 = scalar_lea.hbm %s1189_s1, 2048 }
   0x6   :  { %p875_p0 = scmp.ne.s32.totalorder %s1189_s1, %s874_s15  ;;  %p878_p1 = scmp.lt.u32.totalorder %s874_s15, %s1189_s1 }
   0x8   :  { %p880_p2 = pnand %p878_p1, %p875_p0 }
   0xa   :  { %883 = shalt.err (!%p880_p2)
}
   0xb   :  { %s884_s20 = scalar_lea.vmem %s36_s10, 2048  ;;  %p889_p4 = scmp.lt.s32.totalorder %s36_s10, %s36_s10 }
   0xc   :  { %p885_p3 = scmp.ne.s32.totalorder %s36_s10, %s884_s20  ;;  %p890_p5 = scmp.lt.s32.totalorder %s884_s20, %s884_s20 }
   0xe   :  { %p891_p6 = por %p890_p5, %p889_p4 }
  0x10   :  { %p892_p7 = pnand %p891_p6, %p885_p3 }
  0x12   :  { %895 = shalt.err (!%p892_p7)
}
  0x13   :  { %s1016_s21 = smov 128   ;;  %s1017_s22 = smov 8  }
  0x14   :  { %41 = dma.hbm_to_vmem [thread:$0]  %s1189_s1, 2048, %s36_s10, [#allocation6], %s1016_s21, %s1016_s21, %s1017_s22  }
  0x15   :  { %s896_s27 = scalar_lea.hbm %s1193_s5, 2048 }
  0x16   :  { %p897_p8 = scmp.ne.s32.totalorder %s1193_s5, %s896_s27  ;;  %p900_p9 = scmp.lt.u32.totalorder %s896_s27, %s1193_s5 }
  0x18   :  { %p902_p10 = pnand %p900_p9, %p897_p8 }
  0x1a   :  { %905 = shalt.err (!%p902_p10)
}
  0x1b   :  { %s906_s13 = scalar_lea.vmem %s1072_s12, 2048  ;;  %p911_p12 = scmp.lt.s32.totalorder %s1072_s12, %s1072_s12 }
  0x1c   :  { %p907_p11 = scmp.ne.s32.totalorder %s1072_s12, %s906_s13  ;;  %p912_p13 = scmp.lt.s32.totalorder %s906_s13, %s906_s13 }
  0x1e   :  { %p913_p0 = por %p912_p13, %p911_p12 }
  0x20   :  { %p914_p1 = pnand %p913_p0, %p907_p11 }
  0x22   :  { %917 = shalt.err (!%p914_p1)
}
  0x23   :  { %69 = dma.hbm_to_vmem [thread:$0]  %s1193_s5, 2048, %s1072_s12, [#allocation9], %s1016_s21, %s1016_s21, %s1017_s22  }
  0x24   :  { %s1018_s14 = smov [#allocation2]   ;;  %s1019_s16 = smov [#allocation7]  }
  0x25   :  { %s23_s15 = sshll.u32 %s1018_s14, 4  ;;  %s49_s17 = sshll.u32 %s1019_s16, 4  ;;  %s24_s15 = int_to_ptr.vmem [resolvable:$true] %s23_s15  ;;  %s1109_s17 = int_to_ptr.vmem [resolvable:$true] %s49_s17 }
  0x26   :  { %s918_s20 = scalar_lea.hbm %s1188_s0, 256 }
  0x27   :  { %p919_p2 = scmp.ne.s32.totalorder %s1188_s0, %s918_s20  ;;  %p922_p3 = scmp.lt.u32.totalorder %s918_s20, %s1188_s0 }
  0x29   :  { %p924_p4 = pnand %p922_p3, %p919_p2 }
  0x2b   :  { %927 = shalt.err (!%p924_p4)
}
  0x2c   :  { %s928_s5 = scalar_lea.vmem %s24_s15, 256  ;;  %p933_p6 = scmp.lt.s32.totalorder %s24_s15, %s24_s15 }
  0x2d   :  { %p929_p5 = scmp.ne.s32.totalorder %s24_s15, %s928_s5  ;;  %p934_p7 = scmp.lt.s32.totalorder %s928_s5, %s928_s5 }
  0x2f   :  { %p935_p8 = por %p934_p7, %p933_p6 }
  0x31   :  { %p936_p9 = pnand %p935_p8, %p929_p5 }
  0x33   :  { %939 = shalt.err (!%p936_p9)
}
  0x34   :  { %29 = dma.hbm_to_vmem [thread:$0]  %s1188_s0, 256, %s24_s15, [#allocation3], %s1016_s21, %s1016_s21, %s1017_s22  }
  0x35   :  { %s940_s30 = scalar_lea.hbm %s1191_s3, 2048 }
  0x36   :  { %p941_p10 = scmp.ne.s32.totalorder %s1191_s3, %s940_s30  ;;  %p944_p11 = scmp.lt.u32.totalorder %s940_s30, %s1191_s3 }
  0x38   :  { %p946_p12 = pnand %p944_p11, %p941_p10 }
  0x3a   :  { %949 = shalt.err (!%p946_p12)
}
  0x3b   :  { %s950_s14 = scalar_lea.vmem %s1109_s17, 2048  ;;  %p955_p0 = scmp.lt.s32.totalorder %s1109_s17, %s1109_s17 }
  0x3c   :  { %p951_p13 = scmp.ne.s32.totalorder %s1109_s17, %s950_s14  ;;  %p956_p1 = scmp.lt.s32.totalorder %s950_s14, %s950_s14 }
  0x3e   :  { %p957_p2 = por %p956_p1, %p955_p0 }
  0x40   :  { %p958_p3 = pnand %p957_p2, %p951_p13 }
  0x42   :  { %961 = shalt.err (!%p958_p3)
}
  0x43   :  { %55 = dma.hbm_to_vmem [thread:$0]  %s1191_s3, 2048, %s1109_s17, [#allocation6], %s1016_s21, %s1016_s21, %s1017_s22  }
  0x44   :  { %s1020_s16 = smov [#allocation10]   ;;  %s962_s23 = scalar_lea.hbm %s1195_s7, 2048 }
  0x45   :  { %s77_s18 = sshll.u32 %s1020_s16, 4  ;;  %p963_p4 = scmp.ne.s32.totalorder %s1195_s7, %s962_s23  ;;  %s78_s18 = int_to_ptr.vmem [resolvable:$true] %s77_s18 }
  0x46   :  { %p966_p5 = scmp.lt.u32.totalorder %s962_s23, %s1195_s7 }
  0x48   :  { %p968_p6 = pnand %p966_p5, %p963_p4 }
  0x4a   :  { %971 = shalt.err (!%p968_p6)
}
  0x4b   :  { %s972_s12 = scalar_lea.vmem %s78_s18, 2048  ;;  %p977_p8 = scmp.lt.s32.totalorder %s78_s18, %s78_s18 }
  0x4c   :  { %p973_p7 = scmp.ne.s32.totalorder %s78_s18, %s972_s12  ;;  %p978_p9 = scmp.lt.s32.totalorder %s972_s12, %s972_s12 }
  0x4e   :  { %p979_p10 = por %p978_p9, %p977_p8 }
  0x50   :  { %p980_p11 = pnand %p979_p10, %p973_p7 }
  0x52   :  { %983 = shalt.err (!%p980_p11)
}
  0x53   :  { %83 = dma.hbm_to_vmem [thread:$0]  %s1195_s7, 2048, %s78_s18, [#allocation9], %s1016_s21, %s1016_s21, %s1017_s22  }
  0x54   :  { %1006 = dma.done.wait [#allocation3], 256  }
  0x55   :  { %1007 = vsyncadd [#allocation3], 4294967040 }
  0x56   :  { %1008 = dma.done.wait [#allocation6], 4096  }
  0x57   :  { %1009 = vsyncadd [#allocation6], 4294963200 }
  0x58   :  { %1010 = dma.done.wait [#allocation9], 4096  }
  0x59   :  { %1011 = vsyncadd [#allocation9], 4294963200  ;;  %v103_v0 = vld [vmem:[#allocation5] sm:$0xff]  ;;  %v104_v1 = vld [vmem:[#allocation5 + $0x8] sm:$0xff]  ;;  %s1021_s13 = smov [#allocation11]  }
  0x5a   :  { %v105_v2 = vld [vmem:[#allocation5 + $0x10] sm:$0xff]  ;;  %v738_v3 = vpack.c.bf16 %v104_v1, %v103_v0  ;;  %v106_v4 = vld [vmem:[#allocation5 + $0x18] sm:$0xff]  ;;  %v107_v6 = vld [vmem:[#allocation5 + $0x20] sm:$0xff]  ;;  %s508_s1 = sshll.u32 %s1021_s13, 4  ;;  %s509_s1 = int_to_ptr.vmem [resolvable:$true] %s508_s1 }
  0x5b   :  { %v742_v5 = vpack.c.bf16 %v106_v4, %v105_v2  ;;  %v108_v7 = vld [vmem:[#allocation5 + $0x28] sm:$0xff]  ;;  %v109_v9 = vld [vmem:[#allocation5 + $0x30] sm:$0xff]  ;;  %v110_v10 = vld [vmem:[#allocation5 + $0x38] sm:$0xff]  ;;  %p989_p13 = scmp.lt.s32.totalorder %s509_s1, %s509_s1 }
  0x5c   :  { %739 = vmatprep.subr.bf16.mxu0 %v738_v3  ;;  %v746_v8 = vpack.c.bf16 %v108_v7, %v107_v6  ;;  %v101_v11 = vld [vmem:[#allocation2] sm:$0xff]  ;;  %v203_v12 = vld [vmem:[#allocation7] sm:$0xff]  ;;  %v204_v13 = vld [vmem:[#allocation7 + $0x8] sm:$0xff]  ;;  %v750_v20 = vpack.c.bf16 %v110_v10, %v109_v9 }
  0x5d   :  { %741 = vmatpush3.bf16.msra.mxu0 %v738_v3  ;;  %630 = vmatprep.mubr.f32.mxu0 %v101_v11  ;;  %v205_v14 = vld [vmem:[#allocation7 + $0x10] sm:$0xff]  ;;  %v770_v15 = vpack.c.bf16 %v204_v13, %v203_v12  ;;  %v206_v16 = vld [vmem:[#allocation7 + $0x18] sm:$0xff]  ;;  %v207_v18 = vld [vmem:[#allocation7 + $0x20] sm:$0xff] }
  0x5e   :  { %743 = vmatprep.subr.bf16.mxu0 %v742_v5  ;;  %v774_v17 = vpack.c.bf16 %v206_v16, %v205_v14  ;;  %v208_v19 = vld [vmem:[#allocation7 + $0x28] sm:$0xff]  ;;  %v111_v21 = vld [vmem:[#allocation5 + $0x40] sm:$0xff]  ;;  %v209_v24 = vld [vmem:[#allocation7 + $0x30] sm:$0xff] }
  0x5f   :  { %771 = vmatprep.subr.bf16.mxu1 %v770_v15  ;;  %v112_v22 = vld [vmem:[#allocation5 + $0x48] sm:$0xff]  ;;  %v778_v23 = vpack.c.bf16 %v208_v19, %v207_v18  ;;  %v210_v25 = vld [vmem:[#allocation7 + $0x38] sm:$0xff]  ;;  %v113_v27 = vld [vmem:[#allocation5 + $0x50] sm:$0xff] }
  0x60   :  { %773 = vmatpush3.bf16.msra.mxu1 %v770_v15  ;;  %v754_v26 = vpack.c.bf16 %v112_v22, %v111_v21  ;;  %v114_v28 = vld [vmem:[#allocation5 + $0x58] sm:$0xff]  ;;  %v782_v29 = vpack.c.bf16 %v210_v25, %v209_v24  ;;  %v211_v30 = vld [vmem:[#allocation7 + $0x40] sm:$0xff]  ;;  %v212_v31 = vld [vmem:[#allocation7 + $0x48] sm:$0xff] }
  0x61   :  { %745 = vmatpush3.bf16.msra.mxu0 %v742_v5  ;;  %775 = vmatprep.subr.bf16.mxu1 %v774_v17  ;;  %v758_v32 = vpack.c.bf16 %v114_v28, %v113_v27  ;;  %v115_v33 = vld [vmem:[#allocation5 + $0x60] sm:$0xff]  ;;  %v116_v34 = vld [vmem:[#allocation5 + $0x68] sm:$0xff]  ;;  %v786_v35 = vpack.c.bf16 %v212_v31, %v211_v30  ;;  %v213_v36 = vld [vmem:[#allocation7 + $0x50] sm:$0xff] }
  0x62   :  { %747 = vmatprep.subr.bf16.mxu0 %v746_v8  ;;  %v214_v37 = vld [vmem:[#allocation7 + $0x58] sm:$0xff]  ;;  %v762_v38 = vpack.c.bf16 %v116_v34, %v115_v33  ;;  %v117_v39 = vld [vmem:[#allocation5 + $0x70] sm:$0xff]  ;;  %v215_v42 = vld [vmem:[#allocation7 + $0x60] sm:$0xff] }
  0x63   :  { %v118_v40 = vld [vmem:[#allocation5 + $0x78] sm:$0xff]  ;;  %v790_v41 = vpack.c.bf16 %v214_v37, %v213_v36  ;;  %v216_v43 = vld [vmem:[#allocation7 + $0x68] sm:$0xff]  ;;  %v217_v47 = vld [vmem:[#allocation7 + $0x70] sm:$0xff] }
  0x64   :  { %777 = vmatpush3.bf16.msra.mxu1 %v774_v17  ;;  %v766_v44 = vpack.c.bf16 %v118_v40, %v117_v39  ;;  %v794_v45 = vpack.c.bf16 %v216_v43, %v215_v42  ;;  %v102_v46 = vld [vmem:[#allocation2 + $0x8] sm:$0xff]  ;;  %v303_v50 = vld [vmem:[#allocation8] sm:$0xff]  ;;  %v304_v51 = vld [vmem:[#allocation8 + $0x8] sm:$0xff] }
  0x65   :  { %749 = vmatpush3.bf16.msra.mxu0 %v746_v8  ;;  %779 = vmatprep.subr.bf16.mxu1 %v778_v23  ;;  %v218_v48 = vld [vmem:[#allocation7 + $0x78] sm:$0xff]  ;;  %v305_v52 = vld [vmem:[#allocation8 + $0x10] sm:$0xff]  ;;  %v802_v53 = vpack.c.bf16 %v304_v51, %v303_v50  ;;  %v307_v56 = vld [vmem:[#allocation8 + $0x20] sm:$0xff] }
  0x66   :  { %751 = vmatprep.subr.bf16.mxu0 %v750_v20  ;;  %v798_v49 = vpack.c.bf16 %v218_v48, %v217_v47  ;;  %v306_v54 = vld [vmem:[#allocation8 + $0x18] sm:$0xff]  ;;  %v308_v57 = vld [vmem:[#allocation8 + $0x28] sm:$0xff]  ;;  %v309_v59 = vld [vmem:[#allocation8 + $0x30] sm:$0xff] }
  0x67   :  { %v806_v55 = vpack.c.bf16 %v306_v54, %v305_v52  ;;  %v810_v58 = vpack.c.bf16 %v308_v57, %v307_v56  ;;  %v310_v60 = vld [vmem:[#allocation8 + $0x38] sm:$0xff]  ;;  %v311_v62 = vld [vmem:[#allocation8 + $0x40] sm:$0xff]  ;;  %v312_v63 = vld [vmem:[#allocation8 + $0x48] sm:$0xff] }
  0x68   :  { %781 = vmatpush3.bf16.msra.mxu1 %v778_v23  ;;  %v814_v61 = vpack.c.bf16 %v310_v60, %v309_v59  ;;  %v818_v0 = vpack.c.bf16 %v312_v63, %v311_v62  ;;  %v313_v1 = vld [vmem:[#allocation8 + $0x50] sm:$0xff]  ;;  %v314_v2 = vld [vmem:[#allocation8 + $0x58] sm:$0xff]  ;;  %v315_v4 = vld [vmem:[#allocation8 + $0x60] sm:$0xff] }
  0x69   :  { %753 = vmatpush3.bf16.msra.mxu0 %v750_v20  ;;  %783 = vmatprep.subr.bf16.mxu1 %v782_v29  ;;  %v822_v3 = vpack.c.bf16 %v314_v2, %v313_v1  ;;  %v316_v5 = vld [vmem:[#allocation8 + $0x68] sm:$0xff]  ;;  %v522_v7 = vld [vmem:[%s1190_s2] ss:$0 sm:$0xff]  ;;  %v318_v15 = vld [vmem:[#allocation8 + $0x78] sm:$0xff] }
  0x6a   :  { %755 = vmatprep.subr.bf16.mxu0 %v754_v26  ;;  %v826_v6 = vpack.c.bf16 %v316_v5, %v315_v4  ;;  %v317_v14 = vld [vmem:[#allocation8 + $0x70] sm:$0xff]  ;;  %v403_v17 = vld [vmem:[#allocation10] sm:$0xff]  ;;  %v404_v18 = vld [vmem:[#allocation10 + $0x8] sm:$0xff] }
  0x6b   :  { %v830_v16 = vpack.c.bf16 %v318_v15, %v317_v14  ;;  %v405_v19 = vld [vmem:[#allocation10 + $0x10] sm:$0xff]  ;;  %v834_v20 = vpack.c.bf16 %v404_v18, %v403_v17  ;;  %v406_v21 = vld [vmem:[#allocation10 + $0x18] sm:$0xff]  ;;  %v407_v23 = vld [vmem:[#allocation10 + $0x20] sm:$0xff] }
  0x6c   :  { %785 = vmatpush3.bf16.msra.mxu1 %v782_v29  ;;  %v838_v22 = vpack.c.bf16 %v406_v21, %v405_v19  ;;  %v408_v24 = vld [vmem:[#allocation10 + $0x28] sm:$0xff]  ;;  %v410_v27 = vld [vmem:[#allocation10 + $0x38] sm:$0xff]  ;;  %v411_v29 = vld [vmem:[#allocation10 + $0x40] sm:$0xff] }
  0x6d   :  { %757 = vmatpush3.bf16.msra.mxu0 %v754_v26  ;;  %787 = vmatprep.subr.bf16.mxu1 %v786_v35  ;;  %v842_v25 = vpack.c.bf16 %v408_v24, %v407_v23  ;;  %v409_v26 = vld [vmem:[#allocation10 + $0x30] sm:$0xff]  ;;  %v412_v30 = vld [vmem:[#allocation10 + $0x48] sm:$0xff]  ;;  %v414_v33 = vld [vmem:[#allocation10 + $0x58] sm:$0xff] }
  0x6e   :  { %759 = vmatprep.subr.bf16.mxu0 %v758_v32  ;;  %v846_v28 = vpack.c.bf16 %v410_v27, %v409_v26  ;;  %v850_v31 = vpack.c.bf16 %v412_v30, %v411_v29  ;;  %v416_v36 = vld [vmem:[#allocation10 + $0x68] sm:$0xff]  ;;  %v524_v48 = vld [vmem:[%s1194_s6] ss:$0 sm:$0xff]  ;;  %s984_s6 = scalar_lea.vmem %s509_s1, 256 }
  0x6f   :  { %p985_p12 = scmp.ne.s32.totalorder %s509_s1, %s984_s6  ;;  %p990_p0 = scmp.lt.s32.totalorder %s984_s6, %s984_s6 }
  0x70   :  { %789 = vmatpush3.bf16.msra.mxu1 %v786_v35  ;;  %v415_v35 = vld [vmem:[#allocation10 + $0x60] sm:$0xff] }
  0x71   :  { %761 = vmatpush3.bf16.msra.mxu0 %v758_v32  ;;  %791 = vmatprep.subr.bf16.mxu1 %v790_v41  ;;  %v413_v32 = vld [vmem:[#allocation10 + $0x50] sm:$0xff]  ;;  %v858_v37 = vpack.c.bf16 %v416_v36, %v415_v35  ;;  %p991_p1 = por %p990_p0, %p989_p13 }
  0x72   :  { %763 = vmatprep.subr.bf16.mxu0 %v762_v38  ;;  %v854_v34 = vpack.c.bf16 %v414_v33, %v413_v32 }
  0x73   :  { %p992_p2 = pnand %p991_p1, %p985_p12 }
  0x74   :  { %793 = vmatpush3.bf16.msra.mxu1 %v790_v41 }
  0x75   :  { %765 = vmatpush3.bf16.msra.mxu0 %v762_v38  ;;  %795 = vmatprep.subr.bf16.mxu1 %v794_v45  ;;  %v523_v38 = vld [vmem:[%s1192_s4] ss:$0 sm:$0xff] }
  0x76   :  { %767 = vmatprep.subr.bf16.mxu0 %v766_v44 }
  0x78   :  { %797 = vmatpush3.bf16.msra.mxu1 %v794_v45  ;;  %v417_v45 = vld [vmem:[#allocation10 + $0x70] sm:$0xff] }
  0x79   :  { %769 = vmatpush3.bf16.msra.mxu0 %v766_v44  ;;  %799 = vmatprep.subr.bf16.mxu1 %v798_v49 }
  0x7a   :  { %803 = vmatprep.subr.bf16.mxu0 %v802_v53 }
  0x7c   :  { %631 = vmatmul.mubr.f32.vlgmr.msra.gmra.mrb[0].mxu0 %v102_v46  ;;  %801 = vmatpush3.bf16.msra.mxu1 %v798_v49  ;;  %v418_v46 = vld [vmem:[#allocation10 + $0x78] sm:$0xff] }
  0x7d   :  { %805 = vmatpush3.bf16.msra.mxu0 %v802_v53  ;;  %835 = vmatprep.subr.bf16.mxu1 %v834_v20  ;;  %v862_v47 = vpack.c.bf16 %v418_v46, %v417_v45 }
  0x7e   :  { %807 = vmatprep.subr.bf16.mxu0 %v806_v55 }
  0x81   :  { %809 = vmatpush3.bf16.msra.mxu0 %v806_v55  ;;  %v525_v55 = vld [vmem:[%s1196_s8] ss:$0 sm:$0xff] }
  0x82   :  { %811 = vmatprep.subr.bf16.mxu0 %v810_v58 }
  0x85   :  { %813 = vmatpush3.bf16.msra.mxu0 %v810_v58 }
  0x86   :  { %815 = vmatprep.subr.bf16.mxu0 %v814_v61 }
  0x89   :  { %817 = vmatpush3.bf16.msra.mxu0 %v814_v61 }
  0x8a   :  { %819 = vmatprep.subr.bf16.mxu0 %v818_v0 }
  0x8d   :  { %821 = vmatpush3.bf16.msra.mxu0 %v818_v0 }
  0x8e   :  { %823 = vmatprep.subr.bf16.mxu0 %v822_v3 }
  0x91   :  { %825 = vmatpush3.bf16.msra.mxu0 %v822_v3 }
  0x92   :  { %827 = vmatprep.subr.bf16.mxu0 %v826_v6 }
  0x95   :  { %829 = vmatpush3.bf16.msra.mxu0 %v826_v6 }
  0x96   :  { %831 = vmatprep.subr.bf16.mxu0 %v830_v16 }
  0x99   :  { %833 = vmatpush3.bf16.msra.mxu0 %v830_v16 }
 0x14f   :  { %v632_v8 = vpop.f32.mrb[0].mxu0 }
 0x150   :  { %v198_v9 = vadd.f32 %v632_v8, %v522_v7  ;;  %v192_v10 = vpop.f32.mrb[1].mxu0 }
 0x151   :  { %v193_v11 = vadd.f32 %v522_v7, %v192_v10 }
 0x152   :  { %v202_v13 = vmax.f32 %v198_v9, 0.0 }
 0x153   :  { %v201_v12 = vmax.f32 %v193_v11, 0.0 }
 0x155   :  { %665 = vmatprep.mubr.f32.mxu1 %v201_v12 }
 0x156   :  { %666 = vmatmul.mubr.f32.vlgmr.msra.gmra.mrb[0].mxu1 %v202_v13 }
 0x157   :  { %837 = vmatpush3.bf16.msra.mxu1 %v834_v20 }
 0x158   :  { %839 = vmatprep.subr.bf16.mxu1 %v838_v22 }
 0x15b   :  { %841 = vmatpush3.bf16.msra.mxu1 %v838_v22 }
 0x15c   :  { %843 = vmatprep.subr.bf16.mxu1 %v842_v25 }
 0x15f   :  { %845 = vmatpush3.bf16.msra.mxu1 %v842_v25 }
 0x160   :  { %847 = vmatprep.subr.bf16.mxu1 %v846_v28 }
 0x163   :  { %849 = vmatpush3.bf16.msra.mxu1 %v846_v28 }
 0x164   :  { %851 = vmatprep.subr.bf16.mxu1 %v850_v31 }
 0x167   :  { %853 = vmatpush3.bf16.msra.mxu1 %v850_v31 }
 0x168   :  { %855 = vmatprep.subr.bf16.mxu1 %v854_v34 }
 0x16b   :  { %857 = vmatpush3.bf16.msra.mxu1 %v854_v34 }
 0x16c   :  { %859 = vmatprep.subr.bf16.mxu1 %v858_v37 }
 0x16f   :  { %861 = vmatpush3.bf16.msra.mxu1 %v858_v37 }
 0x170   :  { %863 = vmatprep.subr.bf16.mxu1 %v862_v47 }
 0x173   :  { %865 = vmatpush3.bf16.msra.mxu1 %v862_v47 }
 0x229   :  { %v667_v39 = vpop.f32.mrb[0].mxu1 }
 0x22a   :  { %v298_v40 = vadd.f32 %v667_v39, %v523_v38  ;;  %v292_v41 = vpop.f32.mrb[1].mxu1 }
 0x22b   :  { %v293_v42 = vadd.f32 %v523_v38, %v292_v41 }
 0x22c   :  { %v302_v44 = vmax.f32 %v298_v40, 0.0 }
 0x22d   :  { %v301_v43 = vmax.f32 %v293_v42, 0.0 }
 0x22f   :  { %700 = vmatprep.mubr.f32.mxu0 %v301_v43 }
 0x230   :  { %701 = vmatmul.mubr.f32.vlgmr.msra.gmra.mrb[2].mxu0 %v302_v44 }
 0x303   :  { %v702_v49 = vpop.f32.mrb[2].mxu0 }
 0x304   :  { %v398_v50 = vadd.f32 %v702_v49, %v524_v48  ;;  %v392_v51 = vpop.f32.mrb[3].mxu0 }
 0x305   :  { %v393_v52 = vadd.f32 %v524_v48, %v392_v51 }
 0x306   :  { %v402_v54 = vmax.f32 %v398_v50, 0.0 }
 0x307   :  { %v401_v53 = vmax.f32 %v393_v52, 0.0 }
 0x309   :  { %735 = vmatprep.mubr.f32.mxu1 %v401_v53 }
 0x30a   :  { %736 = vmatmul.mubr.f32.vlgmr.msra.gmra.mrb[2].mxu1 %v402_v54 }
 0x3dd   :  { %v737_v56 = vpop.f32.mrb[2].mxu1 }
 0x3de   :  { %v498_v57 = vadd.f32 %v737_v56, %v525_v55  ;;  %v492_v58 = vpop.f32.mrb[3].mxu1 }
 0x3df   :  { %v493_v59 = vadd.f32 %v525_v55, %v492_v58 }
 0x3e0   :  { %502 = vst [vmem:[#allocation11 + $0x8] sm:$0xff] %v498_v57 }
 0x3e1   :  { %501 = vst [vmem:[#allocation11] sm:$0xff] %v493_v59 }
 0x3e2   :  { %995 = shalt.err (!%p992_p2)
}
 0x3e3   :  { %s996_s8 = scalar_lea.hbm %s1197_s9, 256 }
 0x3e4   :  { %p997_p3 = scmp.ne.s32.totalorder %s1197_s9, %s996_s8  ;;  %p1000_p4 = scmp.lt.u32.totalorder %s996_s8, %s1197_s9 }
 0x3e6   :  { %p1002_p5 = pnand %p1000_p4, %p997_p3 }
 0x3e8   :  { %1005 = shalt.err (!%p1002_p5)
}
 0x3e9   :  { %514 = dma.vmem_to_hbm [thread:$0]  %s509_s1, 256, %s1197_s9, [#allocation4], %s1016_s21, %s1016_s21, %s1017_s22  }
 0x3ea   :  { %1012 = dma.done.wait [#allocation4], 256  }
 0x3eb   :  { %1013 = vsyncadd [#allocation4], 4294967040 }
 0x3ec   :  { %518 = vsyncpa [#allocation3], 1 }
 0x3ed   :  { %519 = vsyncpa [#allocation6], 1 }
 0x3ee   :  { %520 = vsyncpa [#allocation9], 1 }
 0x3ef   :  { %521 = vsyncpa [#allocation4], 1 }

</bundles_post_ra>
